<compile_context>
chip_gen: v7x
topology: tpu7x:2x2x1
jax: 0.10.0
libtpu: 0.0.40
codegen_flags: <defaults>
</compile_context>

<pallas_src>
import functools

import jax
import jax.numpy as jnp
from jax.experimental import pallas as pl
from jax.experimental.pallas import tpu as pltpu


def _round_up(x, m):
    return ((x + m - 1) // m) * m


# VMEM budget for the streamed tiles (double-buffered logits + aux rows + scratch).
# ~20 MiB of tiles under a 40 MiB scoped limit fits every generation with headroom:
#   v5e/v6e: 128 MiB physical (default scoped 16/32 MiB -> raised explicitly here),
#   v7x:      64 MiB physical (leaves >20 MiB for compiler scratch / spills).
_TILE_BUDGET_BYTES = 20 * 1024 * 1024
_VMEM_LIMIT_BYTES = 40 * 1024 * 1024
_MAX_TILE_N = 32768  # keep per-step slabs large (amortize ~0.35us/step) but bounded


def _choose_tile_n(n, c, itemsize):
    """Samples (lane columns) per grid step for the (C, TILE_N) layout."""
    c_pad = _round_up(max(c, 1), 8)
    # Conservative per-column VMEM bytes (lane dim = TILE_N, sublane dims padded):
    per_col = 2 * c_pad * max(itemsize, 4)   # logits tile, double-buffered
    per_col += 2 * 2 * 8 * 4                 # x_t + alpha rows (8-sublane padded), x2 buffers
    per_col += 8 * 4                         # (1, TILE_N) f32 accumulator scratch
    tn = (_TILE_BUDGET_BYTES // per_col) // 128 * 128
    tn = max(128, min(tn, _MAX_TILE_N))
    return int(min(tn, max(128, _round_up(n, 128))))


def _focal_loss_kernel(x_ref, xt_ref, al_ref, out_ref, acc_ref, *,
                       gamma, size_average, inv_n):
    # x_ref  : (C, TILE_N)  channels-first logits tile (native dtype; cast to f32 here)
    # xt_ref : (1, TILE_N)  target logit per sample (gathered in the wrapper)
    # al_ref : (1, TILE_N)  alpha[target] per sample (0 in padded columns)
    # out_ref: (8, 128)     per-parallel-index partial result (lane-dense block)
    # acc_ref: (1, TILE_N)  f32 running per-sample loss accumulator (VMEM scratch)
    i = pl.program_id(1)

    @pl.when(i == 0)
    def _init():
        acc_ref[...] = jnp.zeros_like(acc_ref)

    x = x_ref[...].astype(jnp.float32)            # (C, TN)
    x_t = xt_ref[...].astype(jnp.float32)         # (1, TN)
    alpha = al_ref[...].astype(jnp.float32)       # (1, TN)

    # log-softmax at the target class; class reductions run over the sublane axis.
    m = jnp.max(x, axis=0, keepdims=True)                    # (1, TN)
    denom = jnp.sum(jnp.exp(x - m), axis=0, keepdims=True)   # (1, TN)
    log_p = (x_t - m) - jnp.log(denom)                       # (1, TN), always <= 0
    probs = jnp.exp(log_p)                                   # in [0, 1]
    om = 1.0 - probs

    g = float(gamma)
    if g == 0.0:
        pow_term = jnp.ones_like(om)
    elif g == int(g) and 1 <= int(g) <= 8:
        pow_term = om                              # VPU multiply chain, no EUP exp/log
        for _ in range(int(g) - 1):
            pow_term = pow_term * om
    else:
        pow_term = jnp.power(om, g)

    # Padded columns have alpha == 0 (set in the wrapper) -> contribute exactly 0,
    # so no masking is needed here.
    acc_ref[...] += -alpha * pow_term * log_p

    @pl.when(i == pl.num_programs(1) - 1)
    def _finalize():
        partial = jnp.sum(acc_ref[...])            # one cross-lane reduce per core
        if size_average:
            partial = partial * jnp.float32(inv_n)
        out_ref[...] = jnp.full(out_ref.shape, partial, dtype=out_ref.dtype)


def focal_loss(inputs, targets, alpha, *, gamma=2.0, size_average=True, tile_n=None):
    """inputs: (N, C) float logits; targets: (N,) int; alpha: (C,) or (C, 1) float."""
    n, c = inputs.shape
    targets = targets.astype(jnp.int32)
    alpha_vec = jnp.asarray(alpha, dtype=jnp.float32).reshape(-1)           # (C,)

    # Cheap XLA gathers in the wrapper: per-sample target logit and alpha factor.
    x_t = jnp.take_along_axis(inputs.astype(jnp.float32),
                              targets[:, None], axis=1)[:, 0]               # (N,)
    alpha_t = alpha_vec[targets]                                            # (N,)

    if tile_n is None:
        tile_n = _choose_tile_n(n, c, jnp.dtype(inputs.dtype).itemsize)
    tile_n = int(tile_n)

    num_tiles = _round_up(pl.cdiv(n, tile_n), 2)   # even -> exact 2-way core split
    nt_half = num_tiles // 2
    n_pad = num_tiles * tile_n
    pad = n_pad - n

    # Channels-first, zero-padded layout: lane axis = samples (lane-dense for C << 128).
    # Padded columns get logits=0, x_t=0 and alpha=0 -> exactly 0 loss contribution.
    x_cf = jnp.pad(inputs.T, ((0, 0), (0, pad)))            # (C, n_pad), native dtype
    xt_row = jnp.pad(x_t[None, :], ((0, 0), (0, pad)))      # (1, n_pad) f32
    al_row = jnp.pad(alpha_t[None, :], ((0, 0), (0, pad)))  # (1, n_pad) f32

    kernel = functools.partial(
        _focal_loss_kernel,
        gamma=float(gamma),
        size_average=bool(size_average),
        inv_n=1.0 / float(n),
    )

    col_map = lambda p, i: (0, p * nt_half + i)

    out = pl.pallas_call(
        kernel,
        out_shape=jax.ShapeDtypeStruct((16, 128), jnp.float32),   # one (8,128) slab per parallel index
        grid_spec=pltpu.PrefetchScalarGridSpec(
            num_scalar_prefetch=0,
            grid=(2, nt_half),
            in_specs=[
                pl.BlockSpec((c, tile_n), col_map),   # logits^T tile
                pl.BlockSpec((1, tile_n), col_map),   # target-logit row
                pl.BlockSpec((1, tile_n), col_map),   # alpha row
            ],
            out_specs=pl.BlockSpec((8, 128), lambda p, i: (p, 0)),
            scratch_shapes=[pltpu.VMEM((1, tile_n), jnp.float32)],
        ),
        compiler_params=pltpu.CompilerParams(
            dimension_semantics=("parallel", "arbitrary"),
            vmem_limit_bytes=_VMEM_LIMIT_BYTES,
        ),
    )(x_cf, xt_row, al_row)

    # Each parallel index wrote its (already scaled) partial sum; combine the two.
    return out[0, 0] + out[8, 0]


def _reference(inputs, targets, alpha, gamma, size_average):
    p = jax.nn.softmax(inputs.astype(jnp.float32), axis=1)
    n = inputs.shape[0]
    probs = p[jnp.arange(n), targets]
    a = jnp.asarray(alpha, jnp.float32).reshape(-1)[targets]
    per = -a * (1.0 - probs) ** gamma * jnp.log(probs)
    return jnp.mean(per) if size_average else jnp.sum(per)


if __name__ == "__main__":
    key = jax.random.PRNGKey(0)
    k1, k2, k3, k4 = jax.random.split(key, 4)

    # Case 1: RPN-like focal loss (N anchors, 2 classes), default alpha, averaged.
    N1, C1 = 256, 2
    x1 = jax.random.normal(k1, (N1, C1), dtype=jnp.float32)
    t1 = jax.random.randint(k2, (N1,), 0, C1, dtype=jnp.int32)
    a1 = jnp.ones((C1,), dtype=jnp.float32)        # default alpha = ones(class_num, 1)
    loss1 = focal_loss(x1, t1, a1, gamma=2.0, size_average=True)
    jax.block_until_ready(loss1)
    ref1 = _reference(x1, t1, a1, 2.0, True)
    assert jnp.allclose(loss1, ref1, rtol=2e-4, atol=2e-4), (loss1, ref1)

    # Case 2: N not a multiple of the tile, small explicit tile -> multi-step
    # accumulation per core + zero-padded tail columns; sum reduction, custom alpha.
    N2, C2 = 300, 8
    x2 = jax.random.normal(k3, (N2, C2), dtype=jnp.float32)
    t2 = jax.random.randint(k4, (N2,), 0, C2, dtype=jnp.int32)
    a2 = jnp.linspace(0.25, 1.0, C2, dtype=jnp.float32)
    loss2 = focal_loss(x2, t2, a2, gamma=2.0, size_average=False, tile_n=128)
    jax.block_until_ready(loss2)
    ref2 = _reference(x2, t2, a2, 2.0, False)
    assert jnp.allclose(loss2, ref2, rtol=2e-4, atol=2e-4), (loss2, ref2)

    print("KERNEL_OK")
</pallas_src>

<mosaic_0001>
module attributes {stable_mosaic.version = 11 : i64} {
  func.func @_focal_loss_kernel(%arg0: i32, %arg1: i32, %arg2: memref<2x256xf32, #tpu.memory_space<vmem>>, %arg3: memref<1x256xf32, #tpu.memory_space<vmem>>, %arg4: memref<1x256xf32, #tpu.memory_space<vmem>>, %arg5: memref<8x128xf32, #tpu.memory_space<vmem>>, %arg6: memref<1x256xf32, #tpu.memory_space<vmem>>) attributes {dimension_semantics = [#tpu.dimension_semantics<parallel>, #tpu.dimension_semantics<arbitrary>], iteration_bounds = array<i64: 2, 1>, scalar_prefetch = 0 : i64, scratch_operands = 1 : i64, tpu.core_type = #tpu.core_type<tc>, window_params = [{transform_indices = @transform_0, window_bounds = array<i64: 2, 256>}, {transform_indices = @transform_1, window_bounds = array<i64: 1, 256>}, {transform_indices = @transform_2, window_bounds = array<i64: 1, 256>}, {transform_indices = @transform_3, window_bounds = array<i64: 8, 128>}]} {
    %c0_i32 = arith.constant 0 : i32
    %0 = arith.cmpi eq, %arg1, %c0_i32 : i32
    %1 = arith.extui %0 : i1 to i32
    %c0_i32_0 = arith.constant 0 : i32
    %2 = arith.cmpi ne, %1, %c0_i32_0 : i32
    scf.if %2 {
      %cst_15 = arith.constant 0.000000e+00 : f32
      %30 = vector.broadcast %cst_15 : f32 to vector<1x256xf32>
      %c0_16 = arith.constant 0 : index
      %c0_17 = arith.constant 0 : index
      %31 = vector.load %arg6[%c0_16, %c0_17] : memref<1x256xf32, #tpu.memory_space<vmem>>, vector<1x256xf32>
      tpu.vector_store %arg6[%c0_16, %c0_17], %30 {strides = array<i32>} : memref<1x256xf32, #tpu.memory_space<vmem>>, vector<1x256xf32>,
    } else {
    }
    %c0 = arith.constant 0 : index
    %c0_1 = arith.constant 0 : index
    %3 = vector.load %arg2[%c0, %c0_1] : memref<2x256xf32, #tpu.memory_space<vmem>>, vector<2x256xf32>
    %c0_2 = arith.constant 0 : index
    %c0_3 = arith.constant 0 : index
    %4 = vector.load %arg3[%c0_2, %c0_3] : memref<1x256xf32, #tpu.memory_space<vmem>>, vector<1x256xf32>
    %c0_4 = arith.constant 0 : index
    %c0_5 = arith.constant 0 : index
    %5 = vector.load %arg4[%c0_4, %c0_5] : memref<1x256xf32, #tpu.memory_space<vmem>>, vector<1x256xf32>
    %cst = arith.constant dense<0xFF800000> : vector<256xf32>
    %6 = vector.multi_reduction <maximumf>, %3, %cst [0] : vector<2x256xf32> to vector<256xf32>
    %7 = vector.shape_cast %6 : vector<256xf32> to vector<1x256xf32>
    %8 = vector.broadcast %7 : vector<1x256xf32> to vector<2x256xf32>
    %9 = arith.subf %3, %8 : vector<2x256xf32>
    %10 = math.exp %9 : vector<2x256xf32>
    %cst_6 = arith.constant dense<0.000000e+00> : vector<256xf32>
    %11 = vector.multi_reduction <add>, %10, %cst_6 [0] : vector<2x256xf32> to vector<256xf32>
    %12 = vector.shape_cast %11 : vector<256xf32> to vector<1x256xf32>
    %13 = arith.subf %4, %7 : vector<1x256xf32>
    %14 = math.log %12 : vector<1x256xf32>
    %15 = arith.subf %13, %14 : vector<1x256xf32>
    %16 = math.exp %15 : vector<1x256xf32>
    %cst_7 = arith.constant 1.000000e+00 : f32
    %17 = vector.broadcast %cst_7 : f32 to vector<1x256xf32>
    %18 = arith.subf %17, %16 : vector<1x256xf32>
    %19 = arith.mulf %18, %18 : vector<1x256xf32>
    %c0_8 = arith.constant 0 : index
    %c0_9 = arith.constant 0 : index
    %20 = vector.load %arg6[%c0_8, %c0_9] : memref<1x256xf32, #tpu.memory_space<vmem>>, vector<1x256xf32>
    %cst_10 = arith.constant 0.000000e+00 : f32
    %21 = vector.broadcast %cst_10 : f32 to vector<1x256xf32>
    %22 = arith.subf %21, %5 : vector<1x256xf32>
    %23 = arith.mulf %22, %19 : vector<1x256xf32>
    %24 = arith.mulf %23, %15 : vector<1x256xf32>
    %25 = arith.addf %20, %24 : vector<1x256xf32>
    %c0_11 = arith.constant 0 : index
    %c0_12 = arith.constant 0 : index
    %26 = vector.load %arg6[%c0_11, %c0_12] : memref<1x256xf32, #tpu.memory_space<vmem>>, vector<1x256xf32>
    tpu.vector_store %arg6[%c0_11, %c0_12], %25 {strides = array<i32>} : memref<1x256xf32, #tpu.memory_space<vmem>>, vector<1x256xf32>,
    %c0_i32_13 = arith.constant 0 : i32
    %27 = arith.cmpi eq, %arg1, %c0_i32_13 : i32
    %28 = arith.extui %27 : i1 to i32
    %c0_i32_14 = arith.constant 0 : i32
    %29 = arith.cmpi ne, %28, %c0_i32_14 : i32
    scf.if %29 {
      %c0_15 = arith.constant 0 : index
      %c0_16 = arith.constant 0 : index
      %30 = vector.load %arg6[%c0_15, %c0_16] : memref<1x256xf32, #tpu.memory_space<vmem>>, vector<1x256xf32>
      %31 = vector.shape_cast %30 : vector<1x256xf32> to vector<1x1x256xf32>
      %cst_17 = arith.constant dense<0.000000e+00> : vector<1xf32>
      %32 = vector.multi_reduction <add>, %31, %cst_17 [1, 2] : vector<1x1x256xf32> to vector<1xf32>
      %33 = vector.shape_cast %32 : vector<1xf32> to vector<1x1x1xf32>
      %34 = vector.extract %33[0, 0, 0] : f32 from vector<1x1x1xf32>
      %cst_18 = arith.constant 3.906250e-03 : f32
      %35 = arith.mulf %34, %cst_18 : f32
      %36 = vector.broadcast %35 : f32 to vector<8x128xf32>
      %c0_19 = arith.constant 0 : index
      %c0_20 = arith.constant 0 : index
      %37 = vector.load %arg5[%c0_19, %c0_20] : memref<8x128xf32, #tpu.memory_space<vmem>>, vector<8x128xf32>
      tpu.vector_store %arg5[%c0_19, %c0_20], %36 {strides = array<i32>} : memref<8x128xf32, #tpu.memory_space<vmem>>, vector<8x128xf32>,
    } else {
    }
    return
  }
  func.func @transform_0(%arg0: i32, %arg1: i32) -> (i32, i32) {
    %c1_i32 = arith.constant 1 : i32
    %0 = arith.muli %arg0, %c1_i32 : i32
    %1 = arith.addi %0, %arg1 : i32
    %c0_i32 = arith.constant 0 : i32
    %c0_i32_0 = arith.constant 0 : i32
    return %c0_i32, %1 : i32, i32
  }
  func.func @transform_1(%arg0: i32, %arg1: i32) -> (i32, i32) {
    %c1_i32 = arith.constant 1 : i32
    %0 = arith.muli %arg0, %c1_i32 : i32
    %1 = arith.addi %0, %arg1 : i32
    %c0_i32 = arith.constant 0 : i32
    %c0_i32_0 = arith.constant 0 : i32
    return %c0_i32, %1 : i32, i32
  }
  func.func @transform_2(%arg0: i32, %arg1: i32) -> (i32, i32) {
    %c1_i32 = arith.constant 1 : i32
    %0 = arith.muli %arg0, %c1_i32 : i32
    %1 = arith.addi %0, %arg1 : i32
    %c0_i32 = arith.constant 0 : i32
    %c0_i32_0 = arith.constant 0 : i32
    return %c0_i32, %1 : i32, i32
  }
  func.func @transform_3(%arg0: i32, %arg1: i32) -> (i32, i32) {
    %c0_i32 = arith.constant 0 : i32
    %c0_i32_0 = arith.constant 0 : i32
    return %arg0, %c0_i32 : i32, i32
  }
}

</mosaic_0001>

<bundles_post_ra>
// kernel: tpu_custom_call.1
= control target key start
LH: loop header
LB: loop body
LE: loop exit
PB: predicated region body
PF: predicated region fallthrough
CT: control target
= control target key end

     0   :  { %8 = vsyncpa [#allocation4], 0  ;;  %s1076_s0 = inlined_call_operand.hbm [shape: f32[2,512], index: 0, kind: input, shape index: {}]   ;;  %s1077_s1 = inlined_call_operand.hbm [shape: f32[1,512], index: 1, kind: input, shape index: {}]   ;;  %s1078_s2 = inlined_call_operand.vmem [shape: f32[1,512], index: 2, kind: input, shape index: {}]   ;;  %s1079_s3 = inlined_call_operand.hbm [shape: f32[16,128], index: 3, kind: output, shape index: {}]  }
   0x1   :  { %10 = vsyncpa [#allocation4 + $0x1], 0 }
   0x2   :  { %11 = vsyncpa [#allocation7], 0 }
   0x3   :  { %13 = vsyncpa [#allocation7 + $0x1], 0 }
   0x4   :  { %14 = vsyncpa [#allocation5], 0 }
   0x5   :  { %16 = vsyncpa [#allocation5 + $0x1], 0  ;;  %s835_s12 = smov 0   ;;  %s837_s13 = smov 0  }
   0x6   :  { %s839_s14 = smov 0   ;;  %s841_s15 = smov 0  }
   0x7   :  { %s843_s16 = smov 0   ;;  %s845_s17 = smov 0  }
   0x8 LB: > { %s560_s18 = sadd.s32 4294967295, %s807_s17   ;;  %s561_s19 = sadd.s32 4294967294, %s807_s17   ;;  %s807_s17 = sphi %s845_s17, %s22_s17   ;;  %s803_s16 = sphi %s843_s16, %s1101_s16   ;;  %s799_s15 = sphi %s841_s15, %s1100_s15   ;;  %s795_s14 = sphi %s839_s14, %s1099_s14   ;;  %s791_s13 = sphi %s837_s13, %s1098_s13   ;;  %s787_s12 = sphi %s835_s12, %s1097_s12  }
   0x9   : > { %s34_s20 = sadd.s32 1, %s803_s16  ;;  %s43_s21 = sadd.s32 1, %s795_s14 }
   0xa   : > { %p36_p0 = scmp.ge.s32.totalorder %s34_s20, 2  ;;  %p50_p1 = scmp.ne.s32.totalorder %s795_s14, %s791_s13 }
   0xb   : > { %p51_p2 = scmp.eq.s32.totalorder %s807_s17, 0  ;;  %p56_p3 = scmp.ne.s32.totalorder %s791_s13, %s787_s12 }
   0xc   : > { %s1103_s20 = smov (%p36_p0, %s34_s20), 0  ;;  %p57_p5 = scmp.eq.s32.totalorder %s560_s18, 0 }
   0xd   : > { %p876_p4 = por %p51_p2, %p50_p1  ;;  %s40_s23 = ssub.s32 %s803_s16, %s1103_s20 }
   0xe   : > { %p136_p6 = scmp.eq.s32.totalorder %s560_s18, 1  ;;  %p41_p7 = scmp.eq.s32.totalorder %s40_s23, 0 }
   0xf   : > { %p882_p8 = por %p57_p5, %p56_p3  ;;  %p142_p10 = scmp.eq.s32.totalorder %s561_s19, 1 }
  0x10   : > { %p886_p9 = por %p136_p6, %p50_p1  ;;  %p600_p13 = scmp.lt.s32.totalorder %s807_s17, 2 }
  0x11   : > { %s1083_s24 = scalar_select %p882_p8, 1, 0 }
  0x12   : > { %s1084_s25 = scalar_select %p886_p9, 1, 0 }
  0x13   : > { %s891_s26 = scalar_select %p41_p7, %s795_s14, %s43_s21  }
  0x14   : > { %p893_p11 = por %p142_p10, %p56_p3  ;;  %s900_s28 = sand.u32 1, %s795_s14  }
  0x15   : > { %s564_s29 = sshll.u32 %s900_s28, 2  ;;  %s579_s30 = sshll.u32 %s803_s16, 6 }
  0x16   : > { %s1085_s27 = scalar_select %p893_p11, 1, 0 }
  0x17   : > { %s907_s6 = scalar_lea.hbm %s1076_s0, %s579_s30  ;;  %s166_s7 = scalar_lea.vmem [#allocation3], %s564_s29 }
  0x18   : > { %s175_s8 = sshll.u32 %s166_s7, 4  ;;  %p913_p0 = pnand %p600_p13, %p876_p4  ;;  %s909_s8 = int_to_ptr.vmem [resolvable:$true] %s175_s8 }
  0x19   : > { %s163_s10 = scalar_lea.sflag [#allocation4], %s900_s28  ;;  %s661_s11 = scalar_lea.hbm %s907_s6, 64 }
  0x1a   : > { %p662_p3 = scmp.ne.s32.totalorder %s907_s6, %s661_s11  ;;  %p663_p5 = pneg %p913_p0 }
  0x1b   : > { %s666_s21 = scalar_lea.hbm %s1076_s0, 128  ;;  %p667_p4 = scmp.lt.u32.totalorder %s907_s6, %s1076_s0 }
  0x1c   : > { %p664_p6 = pnand %p663_p5, %p662_p3  ;;  %p668_p10 = scmp.lt.u32.totalorder %s666_s21, %s661_s11 }
  0x1d   : > { %p670_p12 = scmp.lt.u32.totalorder %s661_s11, %s907_s6 }
  0x1e   : > { %p665_p7 = pneg %p664_p6  ;;  %p669_p13 = por %p668_p10, %p667_p4 }
  0x20   : > { %p671_p1 = por %p670_p12, %p669_p13 }
  0x22   : > { %p672_p2 = pnand %p671_p1, %p665_p7 }
  0x24   : > { %675 = shalt.err (!%p672_p2)
}
  0x25   : > { %s676_s29 = scalar_lea.vmem %s909_s8, 64  ;;  %s809_s30 = smov [#allocation3]  }
  0x26   : > { %p677_p3 = scmp.ne.s32.totalorder %s909_s8, %s676_s29  ;;  %s681_s4 = sshll.u32 %s809_s30, 4  ;;  %s682_s4 = int_to_ptr.vmem [resolvable:$false] %s681_s4 }
  0x27   : > { %s683_s5 = scalar_lea.vmem %s682_s4, 128  ;;  %p684_p9 = scmp.lt.s32.totalorder %s909_s8, %s682_s4 }
  0x28   : > { %p679_p6 = pnand %p677_p3, %p663_p5  ;;  %p685_p4 = scmp.lt.s32.totalorder %s683_s5, %s676_s29 }
  0x2a   : > { %p680_p11 = pneg %p679_p6  ;;  %p686_p10 = por %p685_p4, %p684_p9 }
  0x2c   : > { %p687_p12 = pnand %p686_p10, %p680_p11 }
  0x2e   : > { %690 = shalt.err (!%p687_p12)
}
  0x2f   : > { %592 = dma.hbm_to_vmem [thread:$0]  (!%p913_p0), %s907_s6, 64, %s909_s8, %s163_s10  }
  0x30   : > { %p1087_p1 = scmp.lt.s32.totalorder %s807_s17, 3  ;;  %p1088_p2 = scmp.ge.s32.totalorder %s807_s17, 1 }
  0x31   : > { %s567_s11 = sshll.u32 %s900_s28, 1  ;;  %s580_s18 = sshll.u32 %s803_s16, 5 }
  0x32   : > { %p949_p7 = pnand %p1088_p2, %p1087_p1  ;;  %s958_s22 = scalar_lea.hbm %s1077_s1, %s580_s18 }
  0x33   : > { %s186_s23 = scalar_lea.vmem [#allocation6], %s567_s11  ;;  %s183_s6 = scalar_lea.sflag [#allocation7], %s900_s28 }
  0x34   : > { %s1089_s7 = scalar_select %p949_p7, 1, 0 }
  0x35   : > { %s195_s29 = sshll.u32 %s186_s23, 4  ;;  %s691_s8 = scalar_lea.hbm %s958_s22, 32  ;;  %s196_s29 = int_to_ptr.vmem [resolvable:$true] %s195_s29 }
  0x36   : > { %p692_p9 = scmp.ne.s32.totalorder %s958_s22, %s691_s8  ;;  %s696_s4 = scalar_lea.hbm %s1077_s1, 64 }
  0x37   : > { %p697_p3 = scmp.lt.u32.totalorder %s958_s22, %s1077_s1  ;;  %p698_p6 = scmp.lt.u32.totalorder %s696_s4, %s691_s8 }
  0x38   : > { %p694_p11 = pnand %p692_p9, %p663_p5  ;;  %p700_p10 = scmp.lt.u32.totalorder %s691_s8, %s958_s22 }
  0x39   : > { %p699_p4 = por %p698_p6, %p697_p3 }
  0x3a   : > { %p695_p13 = pneg %p694_p11 }
  0x3b   : > { %p701_p12 = por %p700_p10, %p699_p4 }
  0x3d   : > { %p702_p1 = pnand %p701_p12, %p695_p13 }
  0x3f   : > { %705 = shalt.err (!%p702_p1)
}
  0x40   : > { %s706_s28 = scalar_lea.vmem %s196_s29, 32  ;;  %s810_s11 = smov [#allocation6]  }
  0x41   : > { %p707_p2 = scmp.ne.s32.totalorder %s196_s29, %s706_s28  ;;  %s711_s19 = sshll.u32 %s810_s11, 4  ;;  %s712_s19 = int_to_ptr.vmem [resolvable:$false] %s711_s19 }
  0x42   : > { %s713_s21 = scalar_lea.vmem %s712_s19, 64  ;;  %p714_p8 = scmp.lt.s32.totalorder %s196_s29, %s712_s19 }
  0x43   : > { %p709_p9 = pnand %p707_p2, %p663_p5  ;;  %p715_p7 = scmp.lt.s32.totalorder %s713_s21, %s706_s28 }
  0x45   : > { %p710_p11 = pneg %p709_p9  ;;  %p716_p3 = por %p715_p7, %p714_p8 }
  0x47   : > { %p717_p6 = pnand %p716_p3, %p710_p11 }
  0x49   : > { %720 = shalt.err (!%p717_p6)
}
  0x4a   : > { %595 = dma.hbm_to_vmem [thread:$0]  (!%p913_p0), %s958_s22, 32, %s196_s29, %s183_s6  }
  0x4b   : > { %p1090_p13 = scmp.ne.s32.totalorder %s1089_s7, 0 }
  0x4c   : > { %s983_s23 = sand.u32 (!%p1090_p13), 1, %s791_s13   ;;  %p1091_p5 = scmp.ne.s32.totalorder (!%p1090_p13), %s1083_s24, 0 }
  0x4d   : > { %214 = sbr.rel (%p1090_p13) target bundleno = 426 (0x1aa), region = 32  ;;  %s571_s8 = sshll.u32 (!%p1090_p13), %s983_s23, 2 }
  0x4e   : > { %s217_s10 = scalar_lea.sflag (!%p1090_p13), [#allocation4], %s983_s23  ;;  %s220_s30 = scalar_lea.vmem (!%p1090_p13), [#allocation3], %s571_s8 }
  0x54   : > { %774 = dma.done.wait (%p1091_p5), %s217_s10, 64  }
  0x55   : > { %776 = vsyncadd (%p1091_p5), %s217_s10, 4294967232  ;;  %s572_s9 = sshll.u32 %s983_s23, 1  ;;  %s226_s7 = scalar_lea.sflag [#allocation7], %s983_s23 }
  0x56   : > { %s993_s22 = scalar_lea.vmem [#allocation6], %s572_s9 }
  0x57   : > { %778 = dma.done.wait (%p1091_p5), %s226_s7, 32  }
  0x58   : > { %780 = vsyncadd (%p1091_p5), %s226_s7, 4294967264  ;;  %v277_v0 = vlaneseq  ;;  %v811_v1 = vmov 1983009808   ;;  %v812_v5 = vmov 0.0   ;;  %v282_v8 = vld [vmem:[%s220_s30] sm:$0xf] }
  0x59   : > { %v287_v2 = vunpack.c.l.s4 %v811_v1  ;;  %vm296_vm1 = vcmask 1041408   ;;  %v813_v43 = vmov 1966171168   ;;  %v283_v56 = vld [vmem:[%s993_s22] sm:$0x3]  ;;  %s574_s24 = sshll.u32 %s799_s15, 1 }
  0x5a   : > { %vm999_vm0 = vcmp.lt.s32.totalorder %v277_v0, 256  ;;  %v1003_v4 = vshrl.u32 %v277_v0, 7  ;;  %v351_v44 = vunpack.c.l.s4 %v813_v43  ;;  %p268_p8 = scmp.lt.s32.totalorder %s574_s24, 3  ;;  %vm418_vm2 = vcmask 1040384   ;;  %s573_s5 = sshll.u32 %s983_s23, 3 }
  0x5b   : > { %281 = vst.msk [vmem:[#allocation2] sm:$0x3] %vm999_vm0, %v812_v5  ;;  %v288_v6 = vunpack.c.0.s8 %v287_v2  ;;  %s261_s18 = scalar_lea.vmem [#allocation8], %s573_s5  ;;  %s576_s11 = sshll.u32 %s799_s15, 7 }
  0x5c   : > { %v352_v48 = vunpack.c.0.s8 %v351_v44  ;;  %s1105_s24 = smov (!%p268_p8, %s574_s24), 3  ;;  %s448_s28 = sshll.u32 %s261_s18, 4  ;;  %s1029_s28 = int_to_ptr.vmem [resolvable:$true] %s448_s28 }
  0x5d   : > { %v291_v7 = vsub.s32 %v288_v6, %v1003_v4  ;;  %s270_s4 = scalar_lea.vmem %s1078_s2, %s1105_s24  ;;  %s1027_s30 = scalar_lea.hbm %s1079_s3, %s576_s11 }
  0x5e   : > { %v355_v49 = vsub.s32 %v352_v48, %v1003_v4  ;;  %v284_v63 = vld [vmem:[%s270_s4] sm:$0x3]  ;;  %s435_s9 = scalar_lea.sflag [#allocation5], %s983_s23  ;;  %s721_s7 = scalar_lea.vmem %s1029_s28, 128 }
  0x5f   : > { %v292_v9 = vrot.slane %v282_v8, %v291_v7  ;;  %v394_v2 = vsub.f32 0.0, %v284_v63  ;;  %p722_p0 = scmp.ne.s32.totalorder %s1029_s28, %s721_s7  ;;  %p1094_p7 = scmp.ne.s32.totalorder %s1084_s25, 0 }
  0x60   : > { %s814_s15 = smov [#allocation8]  }
  0x61   : > { %v293_v10 = vcombine.high %v292_v9, %v292_v9  ;;  %v297_v11 = vsel %vm296_vm1, %v292_v9, -inf  ;;  %p723_p4 = pnand %p722_p0, %p1094_p7  ;;  %s725_s22 = sshll.u32 %s814_s15, 4  ;;  %s726_s22 = int_to_ptr.vmem [resolvable:$false] %s725_s22 }
  0x62   : > { %v298_v12 = vrot.slane %v297_v11, 4  ;;  %s727_s24 = scalar_lea.vmem %s726_s22, 256  ;;  %p728_p12 = scmp.lt.s32.totalorder %s1029_s28, %s726_s22 }
  0x63   : > { %v304_v13 = vsel %vm296_vm1, %v293_v10, -inf  ;;  %v410_v10 = vsub.s32 0, %v1003_v4  ;;  %p724_p10 = pneg %p723_p4  ;;  %p729_p1 = scmp.lt.s32.totalorder %s727_s24, %s721_s7 }
  0x64   : > { %v299_v14 = vmax.f32 %v297_v11, %v298_v12  ;;  %v305_v15 = vrot.slane %v304_v13, 4  ;;  %v414_v11 = vsub.s32 1, %v1003_v4 }
  0x65   : > { %p730_p2 = por %p729_p1, %p728_p12 }
  0x66   : > { %v300_v16 = vrot.slane %v299_v14, 2  ;;  %v306_v17 = vmax.f32 %v304_v13, %v305_v15 }
  0x67   : > { %p731_p9 = pnand %p730_p2, %p724_p10 }
  0x68   : > { %v301_v18 = vmax.f32 %v299_v14, %v300_v16  ;;  %v307_v19 = vrot.slane %v306_v17, 2 }
  0x6a   : > { %v302_v20 = vrot.slane %v301_v18, 1  ;;  %v308_v21 = vmax.f32 %v306_v17, %v307_v19 }
  0x6c   : > { %v303_v22 = vmax.f32 %v301_v18, %v302_v20  ;;  %v309_v23 = vrot.slane %v308_v21, 1 }
  0x6e   : > { %v310_v24 = vmax.f32 %v308_v21, %v309_v23 }
  0x70   : > { %v313_v25 = vcombine.low %v303_v22, %v310_v24 }
  0x72   : > { %v320_v26 = vrot.slane %v313_v25, %v291_v7  ;;  %v356_v50 = vrot.slane %v313_v25, %v355_v49 }
  0x74   : > { %v322_v27 = vsub.f32 %v282_v8, %v320_v26  ;;  %v363_v54 = vrot.slane %v356_v50, %v355_v49 }
  0x76   : > { %v323_v28 = vmul.f32 1.442695, %v322_v27  ;;  %v365_v58 = vsub.f32 %v283_v56, %v363_v54 }
  0x78   : > { %653 = vpow2.f32 %v323_v28 }
  0x82   : > { %v654_v29 = vpop.eup %653 }
  0x83   : > { %v332_v30 = vrot.slane %v654_v29, %v291_v7  ;;  %v393_v7 = vld [vmem:[#allocation2] sm:$0x3] }
  0x85   : > { %v333_v31 = vcombine.high %v332_v30, %v332_v30  ;;  %v336_v32 = vsel %vm296_vm1, %v332_v30, 0.0 }
  0x86   : > { %v337_v33 = vrot.slane %v336_v32, 4 }
  0x87   : > { %v343_v34 = vsel %vm296_vm1, %v333_v31, 0.0 }
  0x88   : > { %v338_v35 = vadd.f32 %v337_v33, %v336_v32  ;;  %v344_v36 = vrot.slane %v343_v34, 4 }
  0x8a   : > { %v339_v37 = vrot.slane %v338_v35, 2  ;;  %v345_v38 = vadd.f32 %v344_v36, %v343_v34 }
  0x8c   : > { %v340_v39 = vadd.f32 %v339_v37, %v338_v35  ;;  %v346_v40 = vrot.slane %v345_v38, 2 }
  0x8e   : > { %v341_v41 = vrot.slane %v340_v39, 1  ;;  %v347_v42 = vadd.f32 %v346_v40, %v345_v38 }
  0x90   : > { %v342_v45 = vadd.f32 %v341_v41, %v340_v39  ;;  %v348_v46 = vrot.slane %v347_v42, 1 }
  0x92   : > { %v349_v47 = vadd.f32 %v348_v46, %v347_v42  ;;  %655 = vlog2.f32 %v342_v45 }
  0x94   : > { %657 = vlog2.f32 %v349_v47 }
  0x9c   : > { %v656_v51 = vpop.eup %655 }
  0x9d   : > { %v367_v52 = vmul.f32 0.6931472, %v656_v51 }
  0x9e   : > { %v658_v53 = vpop.eup %657 }
  0x9f   : > { %v369_v55 = vmul.f32 0.6931472, %v658_v53 }
  0xa1   : > { %v372_v57 = vcombine.low %v367_v52, %v369_v55 }
  0xa3   : > { %v379_v59 = vrot.slane %v372_v57, %v355_v49 }
  0xa5   : > { %v386_v60 = vrot.slane %v379_v59, %v355_v49 }
  0xa7   : > { %v388_v61 = vsub.f32 %v365_v58, %v386_v60 }
  0xa9   : > { %v389_v62 = vmul.f32 1.442695, %v388_v61 }
  0xab   : > { %659 = vpow2.f32 %v389_v62 }
  0xb5   : > { %v660_v0 = vpop.eup %659 }
  0xb6   : > { %v391_v1 = vsub.f32 1.0, %v660_v0 }
  0xb8   : > { %v392_v5 = vmul.f32 %v391_v1, %v391_v1 }
  0xba   : > { %v395_v6 = vmul.f32 %v394_v2, %v392_v5 }
  0xbc   : > { %v396_v8 = vmul.f32 %v395_v6, %v388_v61 }
  0xbe   : > { %v397_v9 = vadd.f32 %v396_v8, %v393_v7 }
  0xc0   : > { %402 = vst.msk [vmem:[#allocation2] sm:$0x3] %vm999_vm0, %v397_v9 }
  0xc7   : > { %v406_v12 = vld [vmem:[#allocation2] sm:$0x3] }
  0xc8   : > { %v411_v13 = vrot.slane %v406_v12, %v410_v10  ;;  %v415_v14 = vrot.slane %v406_v12, %v414_v11 }
  0xca   : > { %v419_v15 = vsel %vm418_vm2, %v411_v13, 0.0  ;;  %v420_v16 = vsel %vm418_vm2, %v415_v14, 0.0 }
  0xcb   : > { %v421_v17 = vadd.f32 %v420_v16, %v419_v15 }
  0xcd   : > { %422 = vadd.xlane.f32.xlu0 %v421_v17 }
 0x15a   : > { %v423_v18 = vpop.xlane.xlu0 %422 }
 0x15b   : > { %v424_v19 = vrot.slane %v423_v18, 4 }
 0x15d   : > { %v425_v20 = vadd.f32 %v424_v19, %v423_v18 }
 0x15f   : > { %v426_v3 = vrot.slane %v425_v20, 2 }
 0x161   : > { %v427_v21 = vadd.f32 %v426_v3, %v425_v20 }
 0x163   : > { %v428_v22 = vrot.slane %v427_v21, 1 }
 0x165   : > { %v429_v23 = vadd.f32 %v428_v22, %v427_v21 }
 0x167   : > { %581 = vpush %v429_v23 }
 0x198   : > { %s582_s19 = spop %581 }
 0x199   : > { %s431_s21 = smul.f32 0.00390625, %s582_s19 }
 0x19b   : > { %v432_v4 = vstv %s431_s21 }
 0x19c   : > { %433 = vst [vmem:[%s261_s18] sm:$0xff] %v432_v4 }
 0x19d   : > { %734 = shalt.err (!%p731_p9)
}
 0x19e   : > { %s735_s23 = scalar_lea.hbm %s1027_s30, 128  ;;  %s739_s4 = scalar_lea.hbm %s1079_s3, 256 }
 0x19f   : > { %p736_p11 = scmp.ne.s32.totalorder %s1027_s30, %s735_s23  ;;  %p740_p13 = scmp.lt.u32.totalorder %s1027_s30, %s1079_s3 }
 0x1a0   : > { %p741_p5 = scmp.lt.u32.totalorder %s739_s4, %s735_s23  ;;  %p743_p0 = scmp.lt.u32.totalorder %s735_s23, %s1027_s30 }
 0x1a1   : > { %p737_p3 = pnand %p736_p11, %p1094_p7 }
 0x1a2   : > { %p742_p8 = por %p741_p5, %p740_p13 }
 0x1a3   : > { %p738_p6 = pneg %p737_p3 }
 0x1a4   : > { %p744_p4 = por %p743_p0, %p742_p8 }
 0x1a6   : > { %p745_p10 = pnand %p744_p4, %p738_p6 }
 0x1a8   : > { %748 = shalt.err (!%p745_p10)
}
 0x1a9   : > { %587 = dma.vmem_to_hbm [thread:$0]  (%p1094_p7), %s1029_s28, 128, %s1027_s30, %s435_s9  }
 0x1aa PF: > { %s460_s11 = sand.u32 1, %s787_s12   ;;  %p1095_p12 = scmp.ne.s32.totalorder %s1085_s27, 0 }
 0x1ab   : > { %p1096_p1 = scmp.ge.s32.totalorder %s807_s17, 2  ;;  %s461_s19 = scalar_lea.sflag [#allocation5], %s460_s11 }
 0x1ad   : > { %p597_p2 = pnand %p1096_p1, %p1095_p12 }
 0x1af   : > { %782 = dma.done.wait (!%p597_p2), %s461_s19, 128  }
 0x1b0   : > { %784 = vsyncadd (!%p597_p2), %s461_s19, 4294967168  ;;  %s22_s17 = sadd.s32 1, %s807_s17   ;;  %s1097_s12 = smov %s791_s13 }
 0x1b1   : > { %p19_p9 = scmp.ge.s32.totalorder %s22_s17, 4   ;;  %s1098_s13 = smov %s795_s14 }
 0x1b2   : > { %s1099_s14 = smov %s891_s26  ;;  %s1100_s15 = smov %s803_s16 }
 0x1b3   : > { %s1101_s16 = smov %s1103_s20  ;;  %21 = sbr.rel (!%p19_p9) target bundleno = 8 (0x8), region = 101 }
 0x1ba   :  { %466 = vsyncpa [#allocation4], 1 }
 0x1bb   :  { %468 = vsyncpa [#allocation4 + $0x1], 1 }
 0x1bc   :  { %469 = vsyncpa [#allocation7], 1 }
 0x1bd   :  { %471 = vsyncpa [#allocation7 + $0x1], 1 }
 0x1be   :  { %472 = vsyncpa [#allocation5], 1 }
 0x1bf   :  { %474 = vsyncpa [#allocation5 + $0x1], 1 }

</bundles_post_ra>
